<compile_context>
chip_gen: v7x
topology: tpu7x:2x2x1
jax: 0.10.0
libtpu: 0.0.40
codegen_flags: <defaults>
</compile_context>

<pallas_src>
import jax
import jax.numpy as jnp
from jax.experimental import pallas as pl
from jax.experimental.pallas import tpu as pltpu


def _round_up(x: int, m: int) -> int:
    return ((x + m - 1) // m) * m


def _cdiv(a: int, b: int) -> int:
    return (a + b - 1) // b


def film_kernel(feat_ref, cond_ref, wg_ref, bg_ref, wb_ref, bb_ref, out_ref):
    cond = cond_ref[...]
    # Two MXU matmuls with f32 accumulation; "+1" folded into the tiny bias row.
    gamma = jnp.dot(cond, wg_ref[...], preferred_element_type=jnp.float32) + (
        bg_ref[...].astype(jnp.float32) + 1.0
    )
    beta = jnp.dot(cond, wb_ref[...], preferred_element_type=jnp.float32) + bb_ref[
        ...
    ].astype(jnp.float32)
    out_ref[...] = (
        gamma * feat_ref[...].astype(jnp.float32) + beta
    ).astype(out_ref.dtype)


def _choose_tiles(B, F, C, feat_itemsize, w_itemsize, block_b, block_f):
    """Pick (TB, TF): lane-dense, ~4 MiB features/step, v7x-friendly."""
    sublane = {4: 8, 2: 16, 1: 32}.get(feat_itemsize, 8)
    user_override = (block_b is not None) or (block_f is not None)

    TB = block_b if block_b is not None else min(_round_up(B, sublane), 512)
    if block_f is not None:
        TF = block_f
    else:
        # Target ~4 MiB of features per grid step, capped at 2048 lanes.
        tf_cap = ((4 * 1024 * 1024 // feat_itemsize) // max(TB, 1)) // 128 * 128
        tf_cap = max(128, min(tf_cap, 2048))
        # Keep the per-feature-tile weight blocks (2 x (C, TF)) modest so the
        # double-buffered footprint stays inside the 48 MiB limit for large C.
        w_cap = max(128, (8 * 1024 * 1024 // max(2 * C * w_itemsize, 1)) // 128 * 128)
        TF = min(_round_up(F, 128), tf_cap, w_cap)

    # Guarantee >= 2 grid blocks along one "parallel" axis so both of v7x's
    # TensorCores get work; harmless on single-core v5e/v6e.
    if not user_override and _cdiv(B, TB) == 1 and _cdiv(F, TF) == 1:
        if TF >= 256:
            TF = max(128, _round_up(TF // 2, 128))
        elif TB >= 2 * sublane:
            TB = max(sublane, _round_up(TB // 2, sublane))
    return TB, TF


def film_forward(features, conditioning, wg, bg, wb, bb,
                 *, block_b=None, block_f=None, donate_features=False):
    """FiLM forward pass.

    features [B, F], conditioning [B, C], wg/wb [C, F], bg/bb [1, F] -> [B, F]
    Weights are stored as [C, F] (transpose of PyTorch nn.Linear's [out, in]).
    """
    B, F = features.shape
    C = conditioning.shape[1]
    assert wg.shape == (C, F) and wb.shape == (C, F)
    assert bg.shape == (1, F) and bb.shape == (1, F)

    feat_isz = jnp.dtype(features.dtype).itemsize
    cond_isz = jnp.dtype(conditioning.dtype).itemsize
    w_isz = jnp.dtype(wg.dtype).itemsize
    b_isz = jnp.dtype(bg.dtype).itemsize

    TB, TF = _choose_tiles(B, F, C, feat_isz, w_isz, block_b, block_f)
    nb, nf = _cdiv(B, TB), _cdiv(F, TF)
    # Feature axis outer, batch inner: weight blocks stay resident across the
    # inner (batch) steps and are DMA'd only once per feature tile.
    grid = (nf, nb)

    cost = pl.CostEstimate(
        flops=4 * B * C * F + 3 * B * F,
        transcendentals=0,
        bytes_accessed=(
            2 * B * F * feat_isz          # features read + output write
            + nf * B * C * cond_isz       # conditioning re-fetched per feature tile
            + 2 * C * F * w_isz           # Wg/Wb read once (resident across batch)
            + 2 * F * b_isz               # biases
        ),
    )

    # Aliasing is safe: each output block index equals the features block index
    # read in the same grid step, and every block is visited exactly once.
    aliases = {0: 0} if donate_features else {}

    return pl.pallas_call(
        film_kernel,
        out_shape=jax.ShapeDtypeStruct((B, F), features.dtype),
        grid=grid,
        in_specs=[
            pl.BlockSpec((TB, TF), lambda j, i: (i, j)),   # features tile
            pl.BlockSpec((TB, C), lambda j, i: (i, 0)),    # conditioning (full C)
            pl.BlockSpec((C, TF), lambda j, i: (0, j)),    # Wg tile (resident)
            pl.BlockSpec((1, TF), lambda j, i: (0, j)),    # bg tile
            pl.BlockSpec((C, TF), lambda j, i: (0, j)),    # Wb tile (resident)
            pl.BlockSpec((1, TF), lambda j, i: (0, j)),    # bb tile
        ],
        out_specs=pl.BlockSpec((TB, TF), lambda j, i: (i, j)),
        compiler_params=pltpu.CompilerParams(
            dimension_semantics=("parallel", "parallel"),
            vmem_limit_bytes=48 * 1024 * 1024,
        ),
        cost_estimate=cost,
        input_output_aliases=aliases,
    )(features, conditioning, wg, bg, wb, bb)


def init_film_params(feature_dim, conditioning_dim, dtype=jnp.float32):
    # Matches the PyTorch module's deterministic init:
    #   gamma_layer.weight = ones, gamma_layer.bias = zeros
    #   beta_layer.weight  = zeros, beta_layer.bias = zeros
    wg = jnp.ones((conditioning_dim, feature_dim), dtype=dtype)
    bg = jnp.zeros((1, feature_dim), dtype=dtype)
    wb = jnp.zeros((conditioning_dim, feature_dim), dtype=dtype)
    bb = jnp.zeros((1, feature_dim), dtype=dtype)
    return wg, bg, wb, bb


def _film_ref(feat, cond, wg, bg, wb, bb):
    gamma = 1.0 + (cond @ wg + bg)
    beta = cond @ wb + bb
    return gamma * feat + beta


if __name__ == "__main__":
    # NOTE: at these toy shapes the Pallas path is overhead-bound; it exists
    # here to validate correctness.  It pays off for large B*F.
    batch, feature_dim, conditioning_dim = 8, 32, 16

    key = jax.random.PRNGKey(0)
    (k_feat, k_cond, k2_feat, k2_cond, k_wg, k_bg, k_wb, k_bb,
     k3_feat, k3_cond) = jax.random.split(key, 10)
    features = jax.random.normal(k_feat, (batch, feature_dim), dtype=jnp.float32)
    conditioning = jax.random.normal(
        k_cond, (batch, conditioning_dim), dtype=jnp.float32
    )

    # --- Test 1: deterministic init matching the PyTorch module -------------
    wg, bg, wb, bb = init_film_params(feature_dim, conditioning_dim)
    out = jax.block_until_ready(film_forward(features, conditioning, wg, bg, wb, bb))
    ref = _film_ref(features, conditioning, wg, bg, wb, bb)
    assert out.shape == (batch, feature_dim)
    assert jnp.allclose(out, ref, atol=1e-5, rtol=1e-5)

    # --- Test 2: random params, ragged shapes, multi-block grid with masked
    #     edge blocks on both axes (no padding anywhere) --------------------
    B2, F2, C2 = 20, 200, 16
    feat2 = jax.random.normal(k2_feat, (B2, F2), dtype=jnp.float32)
    cond2 = jax.random.normal(k2_cond, (B2, C2), dtype=jnp.float32)
    wg2 = 0.1 * jax.random.normal(k_wg, (C2, F2), dtype=jnp.float32)
    bg2 = 0.1 * jax.random.normal(k_bg, (1, F2), dtype=jnp.float32)
    wb2 = 0.1 * jax.random.normal(k_wb, (C2, F2), dtype=jnp.float32)
    bb2 = 0.1 * jax.random.normal(k_bb, (1, F2), dtype=jnp.float32)
    out2 = jax.block_until_ready(
        film_forward(feat2, cond2, wg2, bg2, wb2, bb2, block_b=8, block_f=128)
    )
    ref2 = _film_ref(feat2, cond2, wg2, bg2, wb2, bb2)
    assert out2.shape == (B2, F2)
    assert jnp.allclose(out2, ref2, atol=1e-4, rtol=1e-4)

    # --- Test 3: auto tile selection + single-tile split (v7x 2-TC path) ----
    B3, F3 = 256, 1024
    feat3 = jax.random.normal(k3_feat, (B3, F3), dtype=jnp.float32)
    cond3 = jax.random.normal(k3_cond, (B3, C2), dtype=jnp.float32)
    wg3 = 0.05 * jax.random.normal(k_wg, (C2, F3), dtype=jnp.float32)
    bg3 = 0.05 * jax.random.normal(k_bg, (1, F3), dtype=jnp.float32)
    wb3 = 0.05 * jax.random.normal(k_wb, (C2, F3), dtype=jnp.float32)
    bb3 = 0.05 * jax.random.normal(k_bb, (1, F3), dtype=jnp.float32)
    out3 = jax.block_until_ready(film_forward(feat3, cond3, wg3, bg3, wb3, bb3))
    ref3 = _film_ref(feat3, cond3, wg3, bg3, wb3, bb3)
    assert out3.shape == (B3, F3)
    assert jnp.allclose(out3, ref3, atol=1e-4, rtol=1e-4)

    print("KERNEL_OK")
</pallas_src>

<mosaic_0001>
module attributes {stable_mosaic.version = 11 : i64} {
  func.func @film_kernel(%arg0: i32, %arg1: i32, %arg2: memref<8x128xf32, #tpu.memory_space<vmem>>, %arg3: memref<8x16xf32, #tpu.memory_space<vmem>>, %arg4: memref<16x128xf32, #tpu.memory_space<vmem>>, %arg5: memref<1x128xf32, #tpu.memory_space<vmem>>, %arg6: memref<16x128xf32, #tpu.memory_space<vmem>>, %arg7: memref<1x128xf32, #tpu.memory_space<vmem>>, %arg8: memref<8x128xf32, #tpu.memory_space<vmem>>) attributes {dimension_semantics = [#tpu.dimension_semantics<parallel>, #tpu.dimension_semantics<parallel>], iteration_bounds = array<i64: 1, 1>, scalar_prefetch = 0 : i64, scratch_operands = 0 : i64, tpu.core_type = #tpu.core_type<tc>, window_params = [{transform_indices = @transform_0, window_bounds = array<i64: 8, 128>}, {transform_indices = @transform_1, window_bounds = array<i64: 8, 16>}, {transform_indices = @transform_2, window_bounds = array<i64: 16, 128>}, {transform_indices = @transform_3, window_bounds = array<i64: 1, 128>}, {transform_indices = @transform_4, window_bounds = array<i64: 16, 128>}, {transform_indices = @transform_5, window_bounds = array<i64: 1, 128>}, {transform_indices = @transform_6, window_bounds = array<i64: 8, 128>}]} {
    %c0 = arith.constant 0 : index
    %c0_0 = arith.constant 0 : index
    %0 = vector.load %arg3[%c0, %c0_0] : memref<8x16xf32, #tpu.memory_space<vmem>>, vector<8x16xf32>
    %c0_1 = arith.constant 0 : index
    %c0_2 = arith.constant 0 : index
    %1 = vector.load %arg4[%c0_1, %c0_2] : memref<16x128xf32, #tpu.memory_space<vmem>>, vector<16x128xf32>
    %cst = arith.constant dense<0.000000e+00> : vector<8x128xf32>
    %2 = tpu.matmul %0, %1, %cst {dimension_numbers = #tpu.dot_dimension_numbers<[1], [0], [0], [1], [0, 0, 1, 1], [], []>} : vector<8x16xf32>, vector<16x128xf32>, vector<8x128xf32> -> vector<8x128xf32>
    %c0_3 = arith.constant 0 : index
    %c0_4 = arith.constant 0 : index
    %3 = vector.load %arg5[%c0_3, %c0_4] : memref<1x128xf32, #tpu.memory_space<vmem>>, vector<1x128xf32>
    %cst_5 = arith.constant 1.000000e+00 : f32
    %4 = vector.broadcast %cst_5 : f32 to vector<1x128xf32>
    %5 = arith.addf %3, %4 : vector<1x128xf32>
    %6 = vector.broadcast %5 : vector<1x128xf32> to vector<8x128xf32>
    %7 = arith.addf %2, %6 : vector<8x128xf32>
    %c0_6 = arith.constant 0 : index
    %c0_7 = arith.constant 0 : index
    %8 = vector.load %arg6[%c0_6, %c0_7] : memref<16x128xf32, #tpu.memory_space<vmem>>, vector<16x128xf32>
    %cst_8 = arith.constant dense<0.000000e+00> : vector<8x128xf32>
    %9 = tpu.matmul %0, %8, %cst_8 {dimension_numbers = #tpu.dot_dimension_numbers<[1], [0], [0], [1], [0, 0, 1, 1], [], []>} : vector<8x16xf32>, vector<16x128xf32>, vector<8x128xf32> -> vector<8x128xf32>
    %c0_9 = arith.constant 0 : index
    %c0_10 = arith.constant 0 : index
    %10 = vector.load %arg7[%c0_9, %c0_10] : memref<1x128xf32, #tpu.memory_space<vmem>>, vector<1x128xf32>
    %11 = vector.broadcast %10 : vector<1x128xf32> to vector<8x128xf32>
    %12 = arith.addf %9, %11 : vector<8x128xf32>
    %c0_11 = arith.constant 0 : index
    %c0_12 = arith.constant 0 : index
    %13 = vector.load %arg2[%c0_11, %c0_12] : memref<8x128xf32, #tpu.memory_space<vmem>>, vector<8x128xf32>
    %14 = arith.mulf %7, %13 : vector<8x128xf32>
    %15 = arith.addf %14, %12 : vector<8x128xf32>
    %c0_13 = arith.constant 0 : index
    %c0_14 = arith.constant 0 : index
    %16 = vector.load %arg8[%c0_13, %c0_14] : memref<8x128xf32, #tpu.memory_space<vmem>>, vector<8x128xf32>
    tpu.vector_store %arg8[%c0_13, %c0_14], %15 {strides = array<i32>} : memref<8x128xf32, #tpu.memory_space<vmem>>, vector<8x128xf32>,
    return
  }
  func.func @transform_0(%arg0: i32, %arg1: i32) -> (i32, i32) {
    %c0_i32 = arith.constant 0 : i32
    return %arg1, %arg0 : i32, i32
  }
  func.func @transform_1(%arg0: i32, %arg1: i32) -> (i32, i32) {
    %c0_i32 = arith.constant 0 : i32
    %c0_i32_0 = arith.constant 0 : i32
    return %arg1, %c0_i32 : i32, i32
  }
  func.func @transform_2(%arg0: i32, %arg1: i32) -> (i32, i32) {
    %c0_i32 = arith.constant 0 : i32
    %c0_i32_0 = arith.constant 0 : i32
    return %c0_i32, %arg0 : i32, i32
  }
  func.func @transform_3(%arg0: i32, %arg1: i32) -> (i32, i32) {
    %c0_i32 = arith.constant 0 : i32
    %c0_i32_0 = arith.constant 0 : i32
    return %c0_i32, %arg0 : i32, i32
  }
  func.func @transform_4(%arg0: i32, %arg1: i32) -> (i32, i32) {
    %c0_i32 = arith.constant 0 : i32
    %c0_i32_0 = arith.constant 0 : i32
    return %c0_i32, %arg0 : i32, i32
  }
  func.func @transform_5(%arg0: i32, %arg1: i32) -> (i32, i32) {
    %c0_i32 = arith.constant 0 : i32
    %c0_i32_0 = arith.constant 0 : i32
    return %c0_i32, %arg0 : i32, i32
  }
  func.func @transform_6(%arg0: i32, %arg1: i32) -> (i32, i32) {
    %c0_i32 = arith.constant 0 : i32
    return %arg1, %arg0 : i32, i32
  }
}

</mosaic_0001>

<bundles_post_ra>
// kernel: tpu_custom_call.1
= control target key start
LH: loop header
LB: loop body
LE: loop exit
PB: predicated region body
PF: predicated region fallthrough
CT: control target
= control target key end

     0   :  { %11 = vsyncpa [#allocation3], 0  ;;  %s528_s0 = inlined_call_operand.hbm [shape: f32[8,32], index: 0, kind: input, shape index: {}]   ;;  %s529_s1 = inlined_call_operand.hbm [shape: f32[8,16], index: 1, kind: input, shape index: {}]   ;;  %s530_s2 = inlined_call_operand.hbm [shape: f32[16,32], index: 2, kind: input, shape index: {}]   ;;  %s531_s3 = inlined_call_operand.vmem [shape: f32[1,32], index: 3, kind: input, shape index: {}]   ;;  %s532_s4 = inlined_call_operand.hbm [shape: f32[16,32], index: 4, kind: input, shape index: {}]   ;;  %s533_s5 = inlined_call_operand.vmem [shape: f32[1,32], index: 5, kind: input, shape index: {}]   ;;  %s534_s6 = inlined_call_operand.hbm [shape: f32[8,32], index: 6, kind: output, shape index: {}]  }
   0x1   :  { %12 = vsyncpa [#allocation6], 0 }
   0x2   :  { %13 = vsyncpa [#allocation9], 0 }
   0x3   :  { %14 = vsyncpa [#allocation4], 0  ;;  %s417_s21 = smov [#allocation5]   ;;  %s418_s23 = smov [#allocation2]  }
   0x4   :  { %s31_s22 = sshll.u32 %s417_s21, 4  ;;  %s21_s24 = sshll.u32 %s418_s23, 4  ;;  %s32_s22 = int_to_ptr.vmem [resolvable:$true] %s31_s22  ;;  %s22_s24 = int_to_ptr.vmem [resolvable:$true] %s21_s24 }
   0x5   :  { %s299_s27 = scalar_lea.hbm %s529_s1, 128 }
   0x6   :  { %p300_p0 = scmp.ne.s32.totalorder %s529_s1, %s299_s27  ;;  %p303_p1 = scmp.lt.u32.totalorder %s299_s27, %s529_s1 }
   0x8   :  { %p305_p2 = pnand %p303_p1, %p300_p0 }
   0xa   :  { %308 = shalt.err (!%p305_p2)
}
   0xb   :  { %s309_s8 = scalar_lea.vmem %s32_s22, 128  ;;  %p314_p4 = scmp.lt.s32.totalorder %s32_s22, %s32_s22 }
   0xc   :  { %p310_p3 = scmp.ne.s32.totalorder %s32_s22, %s309_s8  ;;  %p315_p5 = scmp.lt.s32.totalorder %s309_s8, %s309_s8 }
   0xe   :  { %p316_p6 = por %p315_p5, %p314_p4 }
  0x10   :  { %p317_p7 = pnand %p316_p6, %p310_p3 }
  0x12   :  { %320 = shalt.err (!%p317_p7)
}
  0x13   :  { %34 = dma.hbm_to_vmem [thread:$0]  %s529_s1, 128, %s32_s22, [#allocation6]  }
  0x14   :  { %s321_s13 = scalar_lea.hbm %s528_s0, 128 }
  0x15   :  { %p322_p8 = scmp.ne.s32.totalorder %s528_s0, %s321_s13  ;;  %p325_p9 = scmp.lt.u32.totalorder %s321_s13, %s528_s0 }
  0x17   :  { %p327_p10 = pnand %p325_p9, %p322_p8 }
  0x19   :  { %330 = shalt.err (!%p327_p10)
}
  0x1a   :  { %s331_s18 = scalar_lea.vmem %s22_s24, 128  ;;  %p336_p12 = scmp.lt.s32.totalorder %s22_s24, %s22_s24 }
  0x1b   :  { %p332_p11 = scmp.ne.s32.totalorder %s22_s24, %s331_s18  ;;  %p337_p13 = scmp.lt.s32.totalorder %s331_s18, %s331_s18 }
  0x1d   :  { %p338_p0 = por %p337_p13, %p336_p12 }
  0x1f   :  { %p339_p1 = pnand %p338_p0, %p332_p11 }
  0x21   :  { %342 = shalt.err (!%p339_p1)
}
  0x22   :  { %24 = dma.hbm_to_vmem [thread:$0]  %s528_s0, 128, %s22_s24, [#allocation3]  }
  0x23   :  { %s419_s20 = smov [#allocation7]   ;;  %s343_s25 = scalar_lea.hbm %s530_s2, 256 }
  0x24   :  { %s40_s21 = sshll.u32 %s419_s20, 4  ;;  %p344_p2 = scmp.ne.s32.totalorder %s530_s2, %s343_s25  ;;  %s41_s21 = int_to_ptr.vmem [resolvable:$true] %s40_s21 }
  0x25   :  { %p347_p3 = scmp.lt.u32.totalorder %s343_s25, %s530_s2 }
  0x27   :  { %p349_p4 = pnand %p347_p3, %p344_p2 }
  0x29   :  { %352 = shalt.err (!%p349_p4)
}
  0x2a   :  { %s353_s30 = scalar_lea.vmem %s41_s21, 256  ;;  %p358_p6 = scmp.lt.s32.totalorder %s41_s21, %s41_s21 }
  0x2b   :  { %p354_p5 = scmp.ne.s32.totalorder %s41_s21, %s353_s30  ;;  %p359_p7 = scmp.lt.s32.totalorder %s353_s30, %s353_s30 }
  0x2d   :  { %p360_p8 = por %p359_p7, %p358_p6 }
  0x2f   :  { %p361_p9 = pnand %p360_p8, %p354_p5 }
  0x31   :  { %364 = shalt.err (!%p361_p9)
}
  0x32   :  { %s420_s0 = smov 128   ;;  %s421_s24 = smov 8  }
  0x33   :  { %46 = dma.hbm_to_vmem [thread:$0]  %s530_s2, 256, %s41_s21, [#allocation6], %s420_s0, %s420_s0, %s421_s24  }
  0x34   :  { %s422_s9 = smov [#allocation8]   ;;  %s365_s13 = scalar_lea.hbm %s532_s4, 256 }
  0x35   :  { %s54_s10 = sshll.u32 %s422_s9, 4  ;;  %p366_p10 = scmp.ne.s32.totalorder %s532_s4, %s365_s13  ;;  %s55_s10 = int_to_ptr.vmem [resolvable:$true] %s54_s10 }
  0x36   :  { %p369_p11 = scmp.lt.u32.totalorder %s365_s13, %s532_s4 }
  0x38   :  { %p371_p12 = pnand %p369_p11, %p366_p10 }
  0x3a   :  { %374 = shalt.err (!%p371_p12)
}
  0x3b   :  { %s375_s18 = scalar_lea.vmem %s55_s10, 256  ;;  %p380_p0 = scmp.lt.s32.totalorder %s55_s10, %s55_s10 }
  0x3c   :  { %p376_p13 = scmp.ne.s32.totalorder %s55_s10, %s375_s18  ;;  %p381_p1 = scmp.lt.s32.totalorder %s375_s18, %s375_s18 }
  0x3e   :  { %p382_p2 = por %p381_p1, %p380_p0 }
  0x40   :  { %p383_p3 = pnand %p382_p2, %p376_p13 }
  0x42   :  { %386 = shalt.err (!%p383_p3)
}
  0x43   :  { %60 = dma.hbm_to_vmem [thread:$0]  %s532_s4, 256, %s55_s10, [#allocation9], %s420_s0, %s420_s0, %s421_s24  }
  0x44   :  { %409 = dma.done.wait [#allocation3], 128  }
  0x45   :  { %410 = vsyncadd [#allocation3], 4294967168 }
  0x46   :  { %411 = dma.done.wait [#allocation6], 384  }
  0x47   :  { %412 = vsyncadd [#allocation6], 4294966912 }
  0x48   :  { %413 = dma.done.wait [#allocation9], 256  }
  0x49   :  { %414 = vsyncadd [#allocation9], 4294967040  ;;  %v423_v0 = vmov 0.0|0.0   ;;  %vm424_vm0 = vmmov 0   ;;  %v425_v1 = vmov 0.0   ;;  %v76_v2 = vld [vmem:[#allocation7] sm:$0xff]  ;;  %v81_v9 = vlaneseq }
  0x4a   :  { %283 = vmatprep.subr.bf16.mxu0 %v423_v0  ;;  %286 = vmatprep.subr.bf16.mxu1 %v423_v0  ;;  %v77_v3 = vld [vmem:[#allocation7 + $0x8] sm:$0xff]  ;;  %v160_v4 = vld [vmem:[#allocation8] sm:$0xff]  ;;  %v161_v6 = vld [vmem:[#allocation8 + $0x8] sm:$0xff]  ;;  %vm86_vm1 = vcmask 130048   ;;  %s426_s22 = smov [#allocation10]  }
  0x4b   :  { %273 = vmatprep.mubr.msk.f32.mxu0 %vm424_vm0, %v425_v1  ;;  %280 = vmatprep.mubr.msk.f32.mxu1 %vm424_vm0, %v425_v1  ;;  %v284_v5 = vpack.c.bf16 %v77_v3, %v76_v2  ;;  %v287_v7 = vpack.c.bf16 %v161_v6, %v160_v4  ;;  %v75_v8 = vld [vmem:[#allocation5] sm:$0xff]  ;;  %v82_v10 = vshrl.u32 %v81_v9, 7  ;;  %v78_v11 = vld [vmem:[%s531_s3] sm:$0x1]  ;;  %s249_s23 = sshll.u32 %s426_s22, 4  ;;  %s250_s23 = int_to_ptr.vmem [resolvable:$true] %s249_s23 }
  0x4c   :  { %v79_v12 = vadd.f32 1.0, %v78_v11  ;;  %v261_v15 = vld [vmem:[%s533_s5] ss:$0 sm:$0xff]  ;;  %s387_s3 = scalar_lea.vmem %s250_s23, 128  ;;  %p392_p5 = scmp.lt.s32.totalorder %s250_s23, %s250_s23 }
  0x4d   :  { %285 = vmatpush3.bf16.msra.mxu0 %v284_v5  ;;  %288 = vmatpush3.bf16.msra.mxu1 %v287_v7  ;;  %v83_v13 = vsub.s32 0, %v82_v10  ;;  %v239_v17 = vld [vmem:[#allocation2] sm:$0xff]  ;;  %p388_p4 = scmp.ne.s32.totalorder %s250_s23, %s387_s3  ;;  %p393_p6 = scmp.lt.s32.totalorder %s387_s3, %s387_s3 }
  0x4f   :  { %v84_v14 = vrot.slane %v79_v12, %v83_v13  ;;  %p394_p7 = por %p393_p6, %p392_p5 }
  0x50   :  { %274 = vmatmul.mubr.msk.f32.vlgmr.msra.gmra.mrb[0].mxu0 %vm86_vm1, %v75_v8  ;;  %281 = vmatmul.mubr.msk.f32.vlgmr.msra.gmra.mrb[0].mxu1 %vm86_vm1, %v75_v8 }
  0x51   :  { %p395_p8 = pnand %p394_p7, %p388_p4 }
 0x123   :  { %v156_v16 = vpop.f32.mrb[0].mxu0  ;;  %v235_v20 = vpop.f32.mrb[0].mxu1 }
 0x124   :  { %v157_v18 = vadd.f32 %v156_v16, %v84_v14  ;;  %v275_v19 = vpop.f32.mrb[1].mxu0  ;;  %v236_v21 = vadd.f32 %v261_v15, %v235_v20  ;;  %v282_v22 = vpop.f32.mrb[1].mxu1 }
 0x126   :  { %v240_v23 = vmul.f32 %v239_v17, %v157_v18 }
 0x128   :  { %v241_v24 = vadd.f32 %v240_v23, %v236_v21 }
 0x12a   :  { %242 = vst [vmem:[#allocation10] sm:$0xff] %v241_v24 }
 0x12b   :  { %398 = shalt.err (!%p395_p8)
}
 0x12c   :  { %s399_s26 = scalar_lea.hbm %s534_s6, 128 }
 0x12d   :  { %p400_p9 = scmp.ne.s32.totalorder %s534_s6, %s399_s26  ;;  %p403_p10 = scmp.lt.u32.totalorder %s399_s26, %s534_s6 }
 0x12f   :  { %p405_p11 = pnand %p403_p10, %p400_p9 }
 0x131   :  { %408 = shalt.err (!%p405_p11)
}
 0x132   :  { %252 = dma.vmem_to_hbm [thread:$0]  %s250_s23, 128, %s534_s6, [#allocation4]  }
 0x133   :  { %415 = dma.done.wait [#allocation4], 128  }
 0x134   :  { %416 = vsyncadd [#allocation4], 4294967168 }
 0x135   :  { %256 = vsyncpa [#allocation3], 1 }
 0x136   :  { %257 = vsyncpa [#allocation6], 1 }
 0x137   :  { %258 = vsyncpa [#allocation9], 1 }
 0x138   :  { %259 = vsyncpa [#allocation4], 1 }

</bundles_post_ra>
